<compile_context>
chip_gen: v5e
topology: v5e:2x2
jax: 0.10.0
libtpu: 0.0.40
codegen_flags: <defaults>
</compile_context>

<pallas_src>
import math

import jax
import jax.numpy as jnp
from jax.experimental import pallas as pl
from jax.experimental.pallas import tpu as pltpu


def _round_up(x, m):
    return ((x + m - 1) // m) * m


# --------------------------------------------------------------------------
# Fused kernel: GRU cell (once, at j == 0) + tiled int8 output projection with
# online log-softmax, finalized in place on the last vocab tile.
# --------------------------------------------------------------------------
def _decoder_step_kernel(x_ref, h_ref, wih_ref, whh_ref, bih_ref, bhh_ref,
                         woq_ref, wos_ref, bo_ref,
                         logp_ref, hnew_ref,
                         h_bf_sc, m_sc, l_sc):
    j = pl.program_id(0)
    H = h_ref.shape[-1]
    tile_v = woq_ref.shape[-1]

    @pl.when(j == 0)
    def _():
        # ReLU(dropout(embedding(input))) -- dropout is identity in eval mode.
        x = jnp.maximum(x_ref[...], 0.0)
        h = h_ref[...]
        # Two dense MXU pushes, no zero-padded gate blocks (gate order r, z, n).
        gi = jnp.dot(x, wih_ref[...],
                     preferred_element_type=jnp.float32) + bih_ref[...]
        gh = jnp.dot(h, whh_ref[...],
                     preferred_element_type=jnp.float32) + bhh_ref[...]
        r = jax.nn.sigmoid(gi[:, :H] + gh[:, :H])
        z = jax.nn.sigmoid(gi[:, H:2 * H] + gh[:, H:2 * H])
        n = jnp.tanh(gi[:, 2 * H:] + r * gh[:, 2 * H:])
        h_new = (1.0 - z) * n + z * h
        hnew_ref[...] = h_new
        h_bf_sc[...] = h_new.astype(jnp.bfloat16)
        m_sc[...] = jnp.full_like(m_sc, -jnp.inf)
        l_sc[...] = jnp.zeros_like(l_sc)

    # Output projection for this vocab tile.  int8 weights are dequantized to
    # bf16 (VPU slack), MXU runs bf16 x bf16 with f32 accumulate, per-column
    # scale applied after the dot.
    w_bf = woq_ref[...].astype(jnp.float32).astype(jnp.bfloat16)
    logits = (jnp.dot(h_bf_sc[...], w_bf, preferred_element_type=jnp.float32)
              * wos_ref[...] + bo_ref[...])

    # Write this tile into the resident (B, Vp) output block (lane-aligned).
    col = pl.multiple_of(j * tile_v, 128)
    logp_ref[:, pl.ds(col, tile_v)] = logits

    # Online (flash-style) log-softmax statistics across vocab tiles (f32).
    m_prev = m_sc[...]
    m_new = jnp.maximum(m_prev, jnp.max(logits, axis=-1, keepdims=True))
    alpha = jnp.exp(m_prev - m_new)
    l_sc[...] = alpha * l_sc[...] + jnp.sum(jnp.exp(logits - m_new),
                                            axis=-1, keepdims=True)
    m_sc[...] = m_new

    @pl.when(j == pl.num_programs(0) - 1)
    def _():
        # Finalize log-softmax in place: logp = logits - (m + log(l)).
        lse = m_sc[...] + jnp.log(l_sc[...])
        logp_ref[...] = logp_ref[...] - lse


# --------------------------------------------------------------------------
# Parameters
# --------------------------------------------------------------------------
def make_decoder_params(key, hidden_size, output_size, *, tile_v=8192):
    """Returns (kernel_params, torch_layout_params, tile_v)."""
    H, V = hidden_size, output_size
    ks = jax.random.split(key, 8)
    bound = 1.0 / math.sqrt(H)

    def u(k, shape):
        return jax.random.uniform(k, shape, jnp.float32, -bound, bound)

    torch_params = {
        "embedding": jax.random.normal(ks[0], (V, H), jnp.float32),
        "w_ih": u(ks[1], (3 * H, H)),     # torch nn.GRU weight_ih_l0 (r,z,n)
        "w_hh": u(ks[2], (3 * H, H)),
        "b_ih": u(ks[3], (3 * H,)),
        "b_hh": u(ks[4], (3 * H,)),
        "w_out": u(ks[5], (V, H)),        # nn.Linear(H, V)
        "b_out": u(ks[6], (V,)),
    }

    # --- kernel layout -----------------------------------------------------
    tile_v = min(_round_up(tile_v, 128), _round_up(V, 128))
    vp = _round_up(V, tile_v)
    # No vocab tile may be pure padding, otherwise m/l would see only -1e30.
    assert vp - V < tile_v and tile_v % 128 == 0

    # int8 per-column symmetric quantization of W_out^T (HBM compression).
    w_out_t = torch_params["w_out"].T                                # (H, V)
    scale = jnp.maximum(jnp.max(jnp.abs(w_out_t), axis=0, keepdims=True),
                        1e-8) / 127.0                                # (1, V)
    w_out_q = jnp.clip(jnp.round(w_out_t / scale), -127, 127).astype(jnp.int8)
    w_out_q = jnp.pad(w_out_q, ((0, 0), (0, vp - V)))                # zero pad
    w_out_scale = jnp.pad(scale, ((0, 0), (0, vp - V)), constant_values=1.0)
    b_out = jnp.pad(torch_params["b_out"], (0, vp - V),
                    constant_values=-1e30)[None, :]                  # (1, Vp)

    # GRU weights stay f32 for hidden-state accuracy; at large H switch these
    # to bf16 (and single-buffer them) to fit v7x's 64 MiB VMEM.
    params = {
        "embedding": torch_params["embedding"],
        "w_ih_t": torch_params["w_ih"].T,        # (H, 3H)
        "w_hh_t": torch_params["w_hh"].T,        # (H, 3H)
        "b_ih": torch_params["b_ih"][None, :],   # (1, 3H)
        "b_hh": torch_params["b_hh"][None, :],   # (1, 3H)
        "w_out_q": w_out_q,
        "w_out_scale": w_out_scale,
        "b_out": b_out,
    }
    return params, torch_params, tile_v


# --------------------------------------------------------------------------
# Forward (mirrors DecoderRNN.forward)
# --------------------------------------------------------------------------
def decoder_rnn_forward(params, input_ids, hidden, *, tile_v):
    emb = params["embedding"]
    V, H = emb.shape
    vp = params["w_out_q"].shape[1]
    assert vp % tile_v == 0
    n_v = vp // tile_v

    ids = input_ids.reshape(-1)                  # input.view(-1, 1), seq len 1
    B = ids.shape[0]

    # Embedding gather (glue, plain JAX).
    # TODO(synk): fuse the gather in-kernel (PrefetchScalarGridSpec ids +
    # manual row DMA) to drop one dispatch; dropout not implemented (eval mode).
    x = jnp.take(emb, ids, axis=0).astype(jnp.float32)               # (B, H)
    h0 = hidden.reshape(B, H).astype(jnp.float32)

    # Right-size scoped VMEM (review: 48 MiB was 75% of v7x's 64 MiB VMEM).
    vmem_est = (
        2 * 4 * (2 * B * H + 2 * H * 3 * H + 2 * 3 * H)   # resident f32 inputs (2-buf)
        + 2 * (H * tile_v) + 16 * tile_v                   # streamed int8 W tile + scale/bias
        + 2 * 4 * (B * vp + B * H)                         # outputs
        + 2 * B * H + 8 * B                                # scratch
    )
    vmem_limit = int(min(max(2 * vmem_est, 8 * 1024 * 1024), 40 * 1024 * 1024))

    grid_spec = pltpu.PrefetchScalarGridSpec(
        num_scalar_prefetch=0,
        grid=(n_v,),
        in_specs=[
            pl.BlockSpec((B, H), lambda j: (0, 0)),          # x (resident)
            pl.BlockSpec((B, H), lambda j: (0, 0)),          # h (resident)
            pl.BlockSpec((H, 3 * H), lambda j: (0, 0)),      # Wih^T (resident)
            pl.BlockSpec((H, 3 * H), lambda j: (0, 0)),      # Whh^T (resident)
            pl.BlockSpec((1, 3 * H), lambda j: (0, 0)),      # b_ih
            pl.BlockSpec((1, 3 * H), lambda j: (0, 0)),      # b_hh
            # Streamed vocab tiles (double-buffered by Pallas).  Tuning knob:
            # pipeline_mode=pl.Buffered(3) here if the DMA stream shows gaps.
            pl.BlockSpec((H, tile_v), lambda j: (0, j)),     # W_out^T tile (int8)
            pl.BlockSpec((1, tile_v), lambda j: (0, j)),     # per-column scale
            pl.BlockSpec((1, tile_v), lambda j: (0, j)),     # b_out tile
        ],
        out_specs=(
            # Full-width, constant-index => resident in VMEM for the whole
            # grid; written back to HBM once.
            pl.BlockSpec((B, vp), lambda j: (0, 0)),         # log-probs
            pl.BlockSpec((B, H), lambda j: (0, 0)),          # new hidden
        ),
        scratch_shapes=[
            pltpu.VMEM((B, H), jnp.bfloat16),                # h_new (bf16) for MXU
            pltpu.VMEM((B, 1), jnp.float32),                 # running max
            pltpu.VMEM((B, 1), jnp.float32),                 # running sum-exp
        ],
    )

    logp_padded, h_new = pl.pallas_call(
        _decoder_step_kernel,
        out_shape=(
            jax.ShapeDtypeStruct((B, vp), jnp.float32),
            jax.ShapeDtypeStruct((B, H), jnp.float32),
        ),
        grid_spec=grid_spec,
        compiler_params=pltpu.CompilerParams(
            dimension_semantics=("arbitrary",),
            vmem_limit_bytes=vmem_limit,
        ),
    )(x, h0, params["w_ih_t"], params["w_hh_t"], params["b_ih"],
      params["b_hh"], params["w_out_q"], params["w_out_scale"],
      params["b_out"])

    return logp_padded[:, :V], h_new.reshape(1, B, H)


# --------------------------------------------------------------------------
# Pure-JAX reference (torch GRU equations; projection mirrors the kernel's
# int8-weight / bf16-activation numerics so tolerances are meaningful).
# --------------------------------------------------------------------------
def _reference_forward(tp, kp, input_ids, hidden):
    V, H = tp["embedding"].shape
    ids = input_ids.reshape(-1)
    B = ids.shape[0]
    x = jnp.maximum(jnp.take(tp["embedding"], ids, axis=0), 0.0)
    h = hidden.reshape(B, H)
    gi = x @ tp["w_ih"].T + tp["b_ih"]
    gh = h @ tp["w_hh"].T + tp["b_hh"]
    i_r, i_z, i_n = jnp.split(gi, 3, axis=1)
    h_r, h_z, h_n = jnp.split(gh, 3, axis=1)
    r = jax.nn.sigmoid(i_r + h_r)
    z = jax.nn.sigmoid(i_z + h_z)
    n = jnp.tanh(i_n + r * h_n)
    h_new = (1.0 - z) * n + z * h
    w_bf = kp["w_out_q"][:, :V].astype(jnp.float32).astype(jnp.bfloat16)
    logits = (jnp.dot(h_new.astype(jnp.bfloat16), w_bf,
                      preferred_element_type=jnp.float32)
              * kp["w_out_scale"][:, :V] + tp["b_out"])
    return jax.nn.log_softmax(logits, axis=1), h_new.reshape(1, B, H)


if __name__ == "__main__":
    hidden_size = 128      # lane-aligned hidden
    output_size = 200      # vocab; not a multiple of 128 -> exercises padding
    batch = 8
    tile_v_req = 128       # small tile so the online softmax spans >1 tile

    key = jax.random.PRNGKey(0)
    k_params, k_ids, k_hid = jax.random.split(key, 3)

    params, torch_params, tile_v = make_decoder_params(
        k_params, hidden_size, output_size, tile_v=tile_v_req)

    input_ids = jax.random.randint(k_ids, (batch,), 0, output_size,
                                   dtype=jnp.int32)
    hidden = jax.random.normal(k_hid, (1, batch, hidden_size), jnp.float32)

    fwd = jax.jit(decoder_rnn_forward, static_argnames=("tile_v",))
    logp, h_new = fwd(params, input_ids, hidden, tile_v=tile_v)
    jax.block_until_ready((logp, h_new))

    ref_logp, ref_h = _reference_forward(torch_params, params, input_ids, hidden)

    assert logp.shape == (batch, output_size)
    assert h_new.shape == (1, batch, hidden_size)
    assert jnp.allclose(h_new, ref_h, atol=1e-4, rtol=1e-4), \
        float(jnp.max(jnp.abs(h_new - ref_h)))
    assert jnp.allclose(logp, ref_logp, atol=2e-3, rtol=2e-3), \
        float(jnp.max(jnp.abs(logp - ref_logp)))

    print("KERNEL_OK")
</pallas_src>

<mosaic_0001>
module attributes {stable_mosaic.version = 11 : i64} {
  func.func @_decoder_step_kernel(%arg0: i32, %arg1: memref<8x128xf32, #tpu.memory_space<vmem>>, %arg2: memref<8x128xf32, #tpu.memory_space<vmem>>, %arg3: memref<128x384xf32, #tpu.memory_space<vmem>>, %arg4: memref<128x384xf32, #tpu.memory_space<vmem>>, %arg5: memref<1x384xf32, #tpu.memory_space<vmem>>, %arg6: memref<1x384xf32, #tpu.memory_space<vmem>>, %arg7: memref<128x128xi8, #tpu.memory_space<vmem>>, %arg8: memref<1x128xf32, #tpu.memory_space<vmem>>, %arg9: memref<1x128xf32, #tpu.memory_space<vmem>>, %arg10: memref<8x256xf32, #tpu.memory_space<vmem>>, %arg11: memref<8x128xf32, #tpu.memory_space<vmem>>, %arg12: memref<8x128xbf16, #tpu.memory_space<vmem>>, %arg13: memref<8x1xf32, #tpu.memory_space<vmem>>, %arg14: memref<8x1xf32, #tpu.memory_space<vmem>>) attributes {dimension_semantics = [#tpu.dimension_semantics<arbitrary>], iteration_bounds = array<i64: 2>, scalar_prefetch = 0 : i64, scratch_operands = 3 : i64, tpu.core_type = #tpu.core_type<tc>, window_params = [{pipeline_mode = #tpu.pipeline_mode<synchronous>, transform_indices = @transform_0, window_bounds = array<i64: 8, 128>}, {pipeline_mode = #tpu.pipeline_mode<synchronous>, transform_indices = @transform_1, window_bounds = array<i64: 8, 128>}, {pipeline_mode = #tpu.pipeline_mode<synchronous>, transform_indices = @transform_2, window_bounds = array<i64: 128, 384>}, {pipeline_mode = #tpu.pipeline_mode<synchronous>, transform_indices = @transform_3, window_bounds = array<i64: 128, 384>}, {pipeline_mode = #tpu.pipeline_mode<synchronous>, transform_indices = @transform_4, window_bounds = array<i64: 1, 384>}, {pipeline_mode = #tpu.pipeline_mode<synchronous>, transform_indices = @transform_5, window_bounds = array<i64: 1, 384>}, {transform_indices = @transform_6, window_bounds = array<i64: 128, 128>}, {transform_indices = @transform_7, window_bounds = array<i64: 1, 128>}, {transform_indices = @transform_8, window_bounds = array<i64: 1, 128>}, {pipeline_mode = #tpu.pipeline_mode<synchronous>, transform_indices = @transform_9, window_bounds = array<i64: 8, 256>}, {pipeline_mode = #tpu.pipeline_mode<synchronous>, transform_indices = @transform_10, window_bounds = array<i64: 8, 128>}]} {
    %c0_i32 = arith.constant 0 : i32
    %0 = arith.cmpi eq, %arg0, %c0_i32 : i32
    %1 = arith.extui %0 : i1 to i32
    %c0_i32_0 = arith.constant 0 : i32
    %2 = arith.cmpi ne, %1, %c0_i32_0 : i32
    scf.if %2 {
      %c0_20 = arith.constant 0 : index
      %c0_21 = arith.constant 0 : index
      %37 = vector.load %arg1[%c0_20, %c0_21] : memref<8x128xf32, #tpu.memory_space<vmem>>, vector<8x128xf32>
      %cst_22 = arith.constant 0.000000e+00 : f32
      %38 = vector.broadcast %cst_22 : f32 to vector<8x128xf32>
      %39 = arith.maximumf %37, %38 : vector<8x128xf32>
      %c0_23 = arith.constant 0 : index
      %c0_24 = arith.constant 0 : index
      %40 = vector.load %arg2[%c0_23, %c0_24] : memref<8x128xf32, #tpu.memory_space<vmem>>, vector<8x128xf32>
      %c0_25 = arith.constant 0 : index
      %c0_26 = arith.constant 0 : index
      %41 = vector.load %arg3[%c0_25, %c0_26] : memref<128x384xf32, #tpu.memory_space<vmem>>, vector<128x384xf32>
      %cst_27 = arith.constant dense<0.000000e+00> : vector<8x384xf32>
      %42 = tpu.matmul %39, %41, %cst_27 {dimension_numbers = #tpu.dot_dimension_numbers<[1], [0], [0], [1], [0, 0, 1, 1], [], []>} : vector<8x128xf32>, vector<128x384xf32>, vector<8x384xf32> -> vector<8x384xf32>
      %c0_28 = arith.constant 0 : index
      %c0_29 = arith.constant 0 : index
      %43 = vector.load %arg5[%c0_28, %c0_29] : memref<1x384xf32, #tpu.memory_space<vmem>>, vector<1x384xf32>
      %44 = vector.broadcast %43 : vector<1x384xf32> to vector<8x384xf32>
      %45 = arith.addf %42, %44 : vector<8x384xf32>
      %c0_30 = arith.constant 0 : index
      %c0_31 = arith.constant 0 : index
      %46 = vector.load %arg4[%c0_30, %c0_31] : memref<128x384xf32, #tpu.memory_space<vmem>>, vector<128x384xf32>
      %cst_32 = arith.constant dense<0.000000e+00> : vector<8x384xf32>
      %47 = tpu.matmul %40, %46, %cst_32 {dimension_numbers = #tpu.dot_dimension_numbers<[1], [0], [0], [1], [0, 0, 1, 1], [], []>} : vector<8x128xf32>, vector<128x384xf32>, vector<8x384xf32> -> vector<8x384xf32>
      %c0_33 = arith.constant 0 : index
      %c0_34 = arith.constant 0 : index
      %48 = vector.load %arg6[%c0_33, %c0_34] : memref<1x384xf32, #tpu.memory_space<vmem>>, vector<1x384xf32>
      %49 = vector.broadcast %48 : vector<1x384xf32> to vector<8x384xf32>
      %50 = arith.addf %47, %49 : vector<8x384xf32>
      %51 = vector.extract_strided_slice %45 {offsets = [0, 0], sizes = [8, 128], strides = [1, 1]} : vector<8x384xf32> to vector<8x128xf32>
      %52 = vector.extract_strided_slice %50 {offsets = [0, 0], sizes = [8, 128], strides = [1, 1]} : vector<8x384xf32> to vector<8x128xf32>
      %53 = arith.addf %51, %52 : vector<8x128xf32>
      %54 = arith.negf %53 : vector<8x128xf32>
      %55 = math.exp %54 : vector<8x128xf32>
      %cst_35 = arith.constant 1.000000e+00 : f32
      %56 = vector.broadcast %cst_35 : f32 to vector<8x128xf32>
      %57 = arith.addf %56, %55 : vector<8x128xf32>
      %58 = arith.divf %56, %57 : vector<8x128xf32>
      %59 = vector.extract_strided_slice %45 {offsets = [0, 128], sizes = [8, 128], strides = [1, 1]} : vector<8x384xf32> to vector<8x128xf32>
      %60 = vector.extract_strided_slice %50 {offsets = [0, 128], sizes = [8, 128], strides = [1, 1]} : vector<8x384xf32> to vector<8x128xf32>
      %61 = arith.addf %59, %60 : vector<8x128xf32>
      %62 = arith.negf %61 : vector<8x128xf32>
      %63 = math.exp %62 : vector<8x128xf32>
      %cst_36 = arith.constant 1.000000e+00 : f32
      %64 = vector.broadcast %cst_36 : f32 to vector<8x128xf32>
      %65 = arith.addf %64, %63 : vector<8x128xf32>
      %66 = arith.divf %64, %65 : vector<8x128xf32>
      %67 = vector.extract_strided_slice %45 {offsets = [0, 256], sizes = [8, 128], strides = [1, 1]} : vector<8x384xf32> to vector<8x128xf32>
      %68 = vector.extract_strided_slice %50 {offsets = [0, 256], sizes = [8, 128], strides = [1, 1]} : vector<8x384xf32> to vector<8x128xf32>
      %69 = arith.mulf %58, %68 : vector<8x128xf32>
      %70 = arith.addf %67, %69 : vector<8x128xf32>
      %71 = math.tanh %70 : vector<8x128xf32>
      %cst_37 = arith.constant 1.000000e+00 : f32
      %72 = vector.broadcast %cst_37 : f32 to vector<8x128xf32>
      %73 = arith.subf %72, %66 : vector<8x128xf32>
      %74 = arith.mulf %73, %71 : vector<8x128xf32>
      %75 = arith.mulf %66, %40 : vector<8x128xf32>
      %76 = arith.addf %74, %75 : vector<8x128xf32>
      %c0_38 = arith.constant 0 : index
      %c0_39 = arith.constant 0 : index
      %77 = vector.load %arg11[%c0_38, %c0_39] : memref<8x128xf32, #tpu.memory_space<vmem>>, vector<8x128xf32>
      tpu.vector_store %arg11[%c0_38, %c0_39], %76 {strides = array<i32>} : memref<8x128xf32, #tpu.memory_space<vmem>>, vector<8x128xf32>,
      %78 = arith.truncf %76 : vector<8x128xf32> to vector<8x128xbf16>
      %c0_40 = arith.constant 0 : index
      %c0_41 = arith.constant 0 : index
      %79 = vector.load %arg12[%c0_40, %c0_41] : memref<8x128xbf16, #tpu.memory_space<vmem>>, vector<8x128xbf16>
      tpu.vector_store %arg12[%c0_40, %c0_41], %78 {strides = array<i32>} : memref<8x128xbf16, #tpu.memory_space<vmem>>, vector<8x128xbf16>,
      %cst_42 = arith.constant 0xFF800000 : f32
      %80 = vector.broadcast %cst_42 : f32 to vector<8x1xf32>
      %c0_43 = arith.constant 0 : index
      %c0_44 = arith.constant 0 : index
      %81 = vector.load %arg13[%c0_43, %c0_44] : memref<8x1xf32, #tpu.memory_space<vmem>>, vector<8x1xf32>
      tpu.vector_store %arg13[%c0_43, %c0_44], %80 {strides = array<i32>} : memref<8x1xf32, #tpu.memory_space<vmem>>, vector<8x1xf32>,
      %cst_45 = arith.constant 0.000000e+00 : f32
      %82 = vector.broadcast %cst_45 : f32 to vector<8x1xf32>
      %c0_46 = arith.constant 0 : index
      %c0_47 = arith.constant 0 : index
      %83 = vector.load %arg14[%c0_46, %c0_47] : memref<8x1xf32, #tpu.memory_space<vmem>>, vector<8x1xf32>
      tpu.vector_store %arg14[%c0_46, %c0_47], %82 {strides = array<i32>} : memref<8x1xf32, #tpu.memory_space<vmem>>, vector<8x1xf32>,
    } else {
    }
    %c0 = arith.constant 0 : index
    %c0_1 = arith.constant 0 : index
    %3 = vector.load %arg7[%c0, %c0_1] : memref<128x128xi8, #tpu.memory_space<vmem>>, vector<128x128xi8>
    %4 = arith.sitofp %3 : vector<128x128xi8> to vector<128x128xf32>
    %5 = arith.truncf %4 : vector<128x128xf32> to vector<128x128xbf16>
    %c0_2 = arith.constant 0 : index
    %c0_3 = arith.constant 0 : index
    %6 = vector.load %arg12[%c0_2, %c0_3] : memref<8x128xbf16, #tpu.memory_space<vmem>>, vector<8x128xbf16>
    %cst = arith.constant dense<0.000000e+00> : vector<8x128xf32>
    %7 = tpu.matmul %6, %5, %cst {dimension_numbers = #tpu.dot_dimension_numbers<[1], [0], [0], [1], [0, 0, 1, 1], [], []>} : vector<8x128xbf16>, vector<128x128xbf16>, vector<8x128xf32> -> vector<8x128xf32>
    %c0_4 = arith.constant 0 : index
    %c0_5 = arith.constant 0 : index
    %8 = vector.load %arg8[%c0_4, %c0_5] : memref<1x128xf32, #tpu.memory_space<vmem>>, vector<1x128xf32>
    %9 = vector.broadcast %8 : vector<1x128xf32> to vector<8x128xf32>
    %10 = arith.mulf %7, %9 : vector<8x128xf32>
    %c0_6 = arith.constant 0 : index
    %c0_7 = arith.constant 0 : index
    %11 = vector.load %arg9[%c0_6, %c0_7] : memref<1x128xf32, #tpu.memory_space<vmem>>, vector<1x128xf32>
    %12 = vector.broadcast %11 : vector<1x128xf32> to vector<8x128xf32>
    %13 = arith.addf %10, %12 : vector<8x128xf32>
    %c128_i32 = arith.constant 128 : i32
    %14 = arith.muli %arg0, %c128_i32 : i32
    %15 = tpu.assume_multiple %14, 128 : i32
    %c0_8 = arith.constant 0 : index
    %16 = arith.index_cast %15 : i32 to index
    %17 = vector.load %arg10[%c0_8, %16] : memref<8x256xf32, #tpu.memory_space<vmem>>, vector<8x128xf32>
    tpu.vector_store %arg10[%c0_8, %16], %13 {strides = array<i32>} : memref<8x256xf32, #tpu.memory_space<vmem>>, vector<8x128xf32>,
    %c0_9 = arith.constant 0 : index
    %c0_10 = arith.constant 0 : index
    %18 = vector.load %arg13[%c0_9, %c0_10] : memref<8x1xf32, #tpu.memory_space<vmem>>, vector<8x1xf32>
    %cst_11 = arith.constant dense<0xFF800000> : vector<8xf32>
    %19 = vector.multi_reduction <maximumf>, %13, %cst_11 [1] : vector<8x128xf32> to vector<8xf32>
    %20 = vector.shape_cast %19 : vector<8xf32> to vector<8x1xf32>
    %21 = arith.maximumf %18, %20 : vector<8x1xf32>
    %22 = arith.subf %18, %21 : vector<8x1xf32>
    %23 = math.exp %22 : vector<8x1xf32>
    %c0_12 = arith.constant 0 : index
    %c0_13 = arith.constant 0 : index
    %24 = vector.load %arg14[%c0_12, %c0_13] : memref<8x1xf32, #tpu.memory_space<vmem>>, vector<8x1xf32>
    %25 = arith.mulf %23, %24 : vector<8x1xf32>
    %26 = vector.broadcast %21 : vector<8x1xf32> to vector<8x128xf32>
    %27 = arith.subf %13, %26 : vector<8x128xf32>
    %28 = math.exp %27 : vector<8x128xf32>
    %cst_14 = arith.constant dense<0.000000e+00> : vector<8xf32>
    %29 = vector.multi_reduction <add>, %28, %cst_14 [1] : vector<8x128xf32> to vector<8xf32>
    %30 = vector.shape_cast %29 : vector<8xf32> to vector<8x1xf32>
    %31 = arith.addf %25, %30 : vector<8x1xf32>
    %c0_15 = arith.constant 0 : index
    %c0_16 = arith.constant 0 : index
    %32 = vector.load %arg14[%c0_15, %c0_16] : memref<8x1xf32, #tpu.memory_space<vmem>>, vector<8x1xf32>
    tpu.vector_store %arg14[%c0_15, %c0_16], %31 {strides = array<i32>} : memref<8x1xf32, #tpu.memory_space<vmem>>, vector<8x1xf32>,
    %c0_17 = arith.constant 0 : index
    %c0_18 = arith.constant 0 : index
    %33 = vector.load %arg13[%c0_17, %c0_18] : memref<8x1xf32, #tpu.memory_space<vmem>>, vector<8x1xf32>
    tpu.vector_store %arg13[%c0_17, %c0_18], %21 {strides = array<i32>} : memref<8x1xf32, #tpu.memory_space<vmem>>, vector<8x1xf32>,
    %c1_i32 = arith.constant 1 : i32
    %34 = arith.cmpi eq, %arg0, %c1_i32 : i32
    %35 = arith.extui %34 : i1 to i32
    %c0_i32_19 = arith.constant 0 : i32
    %36 = arith.cmpi ne, %35, %c0_i32_19 : i32
    scf.if %36 {
      %c0_20 = arith.constant 0 : index
      %c0_21 = arith.constant 0 : index
      %37 = vector.load %arg13[%c0_20, %c0_21] : memref<8x1xf32, #tpu.memory_space<vmem>>, vector<8x1xf32>
      %c0_22 = arith.constant 0 : index
      %c0_23 = arith.constant 0 : index
      %38 = vector.load %arg14[%c0_22, %c0_23] : memref<8x1xf32, #tpu.memory_space<vmem>>, vector<8x1xf32>
      %39 = math.log %38 : vector<8x1xf32>
      %40 = arith.addf %37, %39 : vector<8x1xf32>
      %c0_24 = arith.constant 0 : index
      %c0_25 = arith.constant 0 : index
      %41 = vector.load %arg10[%c0_24, %c0_25] : memref<8x256xf32, #tpu.memory_space<vmem>>, vector<8x256xf32>
      %42 = vector.broadcast %40 : vector<8x1xf32> to vector<8x256xf32>
      %43 = arith.subf %41, %42 : vector<8x256xf32>
      %c0_26 = arith.constant 0 : index
      %c0_27 = arith.constant 0 : index
      %44 = vector.load %arg10[%c0_26, %c0_27] : memref<8x256xf32, #tpu.memory_space<vmem>>, vector<8x256xf32>
      tpu.vector_store %arg10[%c0_26, %c0_27], %43 {strides = array<i32>} : memref<8x256xf32, #tpu.memory_space<vmem>>, vector<8x256xf32>,
    } else {
    }
    return
  }
  func.func @transform_0(%arg0: i32) -> (i32, i32) {
    %c0_i32 = arith.constant 0 : i32
    %c0_i32_0 = arith.constant 0 : i32
    %c0_i32_1 = arith.constant 0 : i32
    return %c0_i32, %c0_i32_0 : i32, i32
  }
  func.func @transform_1(%arg0: i32) -> (i32, i32) {
    %c0_i32 = arith.constant 0 : i32
    %c0_i32_0 = arith.constant 0 : i32
    %c0_i32_1 = arith.constant 0 : i32
    return %c0_i32, %c0_i32_0 : i32, i32
  }
  func.func @transform_2(%arg0: i32) -> (i32, i32) {
    %c0_i32 = arith.constant 0 : i32
    %c0_i32_0 = arith.constant 0 : i32
    %c0_i32_1 = arith.constant 0 : i32
    return %c0_i32, %c0_i32_0 : i32, i32
  }
  func.func @transform_3(%arg0: i32) -> (i32, i32) {
    %c0_i32 = arith.constant 0 : i32
    %c0_i32_0 = arith.constant 0 : i32
    %c0_i32_1 = arith.constant 0 : i32
    return %c0_i32, %c0_i32_0 : i32, i32
  }
  func.func @transform_4(%arg0: i32) -> (i32, i32) {
    %c0_i32 = arith.constant 0 : i32
    %c0_i32_0 = arith.constant 0 : i32
    %c0_i32_1 = arith.constant 0 : i32
    return %c0_i32, %c0_i32_0 : i32, i32
  }
  func.func @transform_5(%arg0: i32) -> (i32, i32) {
    %c0_i32 = arith.constant 0 : i32
    %c0_i32_0 = arith.constant 0 : i32
    %c0_i32_1 = arith.constant 0 : i32
    return %c0_i32, %c0_i32_0 : i32, i32
  }
  func.func @transform_6(%arg0: i32) -> (i32, i32) {
    %c0_i32 = arith.constant 0 : i32
    %c0_i32_0 = arith.constant 0 : i32
    return %c0_i32, %arg0 : i32, i32
  }
  func.func @transform_7(%arg0: i32) -> (i32, i32) {
    %c0_i32 = arith.constant 0 : i32
    %c0_i32_0 = arith.constant 0 : i32
    return %c0_i32, %arg0 : i32, i32
  }
  func.func @transform_8(%arg0: i32) -> (i32, i32) {
    %c0_i32 = arith.constant 0 : i32
    %c0_i32_0 = arith.constant 0 : i32
    return %c0_i32, %arg0 : i32, i32
  }
  func.func @transform_9(%arg0: i32) -> (i32, i32) {
    %c0_i32 = arith.constant 0 : i32
    %c0_i32_0 = arith.constant 0 : i32
    %c0_i32_1 = arith.constant 0 : i32
    return %c0_i32, %c0_i32_0 : i32, i32
  }
  func.func @transform_10(%arg0: i32) -> (i32, i32) {
    %c0_i32 = arith.constant 0 : i32
    %c0_i32_0 = arith.constant 0 : i32
    %c0_i32_1 = arith.constant 0 : i32
    return %c0_i32, %c0_i32_0 : i32, i32
  }
}

</mosaic_0001>

<bundles_post_ra>
// kernel: decoder_rnn_forward.1
= control target key start
LH: loop header
LB: loop body
LE: loop exit
PB: predicated region body
PF: predicated region fallthrough
CT: control target
= control target key end

     0   :  { %s1469_s0 = inlined_call_operand.vmem [shape: f32[8,128], index: 0, kind: input, shape index: {}]   ;;  %s1470_s1 = inlined_call_operand.vmem [shape: f32[8,128], index: 1, kind: input, shape index: {}]   ;;  %s1471_s2 = inlined_call_operand.hbm [shape: f32[128,384], index: 2, kind: input, shape index: {}]   ;;  %s1472_s3 = inlined_call_operand.hbm [shape: f32[128,384], index: 3, kind: input, shape index: {}]   ;;  %s1473_s4 = inlined_call_operand.vmem [shape: f32[1,384], index: 4, kind: input, shape index: {}]   ;;  %s1474_s5 = inlined_call_operand.vmem [shape: f32[1,384], index: 5, kind: input, shape index: {}]   ;;  %s1475_s6 = inlined_call_operand.vmem [shape: s8[128,256], index: 6, kind: input, shape index: {}]   ;;  %s1476_s7 = inlined_call_operand.vmem [shape: f32[1,256], index: 7, kind: input, shape index: {}]   ;;  %s1477_s8 = inlined_call_operand.vmem [shape: f32[1,256], index: 8, kind: input, shape index: {}]   ;;  %s1478_s9 = inlined_call_operand.hbm [shape: f32[8,256], index: 9, kind: output, shape index: {0}]   ;;  %s1479_s10 = inlined_call_operand.hbm [shape: f32[8,128], index: 10, kind: output, shape index: {1}]  }
   0x1   :  { %1480 = sst [smem:[#allocation18_spill]] %s1471_s2 }
   0x2   :  { %16 = vsyncpa [#allocation6], 0 }
   0x3   :  { %17 = vsyncpa [#allocation9], 0 }
   0x4   :  { %18 = vsyncpa [#allocation7], 0 }
   0x5   :  { %19 = vsyncpa [#allocation13], 0  ;;  %s1312_s13 = smov 0   ;;  %s1314_s14 = smov 0  }
   0x6   :  { %s1316_s15 = smov 0  }
   0x7 LB: > { %s1328_s16 = sadd.s32 4294967295, %s1245_s15   ;;  %s1331_s17 = sadd.s32 1, %s1245_s15   ;;  %s1245_s15 = sphi %s1316_s15, %s1486_s15   ;;  %s1241_s14 = sphi %s1314_s14, %s1485_s14   ;;  %s1237_s13 = sphi %s1312_s13, %s1484_s13  }
   0x8   : > { %s155_s18 = ssub.s32 %s1245_s15, %s1331_s17  ;;  %s158_s19 = sadd.s32 1, %s1241_s14 }
   0x9   : > { %p156_p0 = scmp.eq.s32.totalorder %s155_s18, 0  ;;  %p165_p1 = scmp.ne.s32.totalorder %s1241_s14, %s1237_s13 }
   0xa   : > { %p166_p2 = scmp.eq.s32.totalorder %s1245_s15, 0  ;;  %p984_p3 = scmp.ge.s32.totalorder %s1245_s15, 1 }
   0xb   : > { %s1341_s20 = scalar_select %p156_p0, %s1241_s14, %s158_s19  }
   0xc   : > { %p1343_p4 = por %p166_p2, %p165_p1  ;;  %p276_p5 = scmp.lt.s32.totalorder %s1245_s15, 3 }
   0xd   : > { %p985_p6 = scmp.ne.s32.totalorder %s1328_s16, 0  ;;  %p1029_p7 = scmp.eq.s32.totalorder %s1328_s16, 0 }
   0xe   : > { %p1350_p8 = pnand %p984_p3, %p276_p5  ;;  %s1483_s2 = sld [smem:[#allocation18_spill]] }
   0xf   : > { %s1247_s26 = smov [#allocation5]   ;;  %s307_s30 = sshll.u32 %s1472_s3, 4  ;;  %s308_s30 = int_to_ptr.hbm [resolvable:$true] %s307_s30 }
  0x10   : > { %p1022_p9 = pneg %p1350_p8  ;;  %s295_s27 = sshll.u32 %s1247_s26, 4  ;;  %s296_s27 = int_to_ptr.vmem [resolvable:$true] %s295_s27 }
  0x11   : > { %s1248_s11 = smov 384   ;;  %s1249_s12 = smov 24  }
  0x12   : > { %p1023_p10 = pnand %p1029_p7, %p1022_p9  ;;  %s1250_s18 = smov [#allocation8]  }
  0x13   : > { %s309_s19 = sshll.u32 %s1250_s18, 4  ;;  %p987_p11 = scmp.ge.s32.totalorder %s1245_s15, 2  ;;  %s310_s19 = int_to_ptr.vmem [resolvable:$true] %s309_s19 }
  0x14   : > { %s293_s25 = sshll.u32 %s1483_s2, 4  ;;  %s294_s25 = int_to_ptr.hbm [resolvable:$true] %s293_s25 }
  0x15   : > { %1025 = dma.hbm_to_vmem [thread:$0]  (!%p1023_p10), %s294_s25, 6144, %s296_s27, [#allocation6], %s1248_s11, %s1248_s11, %s1249_s12  }
  0x16   : > { %1028 = dma.hbm_to_vmem [thread:$0]  (!%p1023_p10), %s308_s30, 6144, %s310_s19, [#allocation9], %s1248_s11, %s1248_s11, %s1249_s12  }
  0x17   : > { %325 = sbr.rel (%p987_p11) target bundleno = 36 (0x24), region = 40 }
  0x1c   : > { %328 = sbr.rel (!%p1343_p4) target bundleno = 36 (0x24), region = 44  ;;  %s330_s23 = sand.u32 (%p1343_p4), 1, %s1241_s14  }
  0x1d   : > { %s989_s24 = sshll.u32 (%p1343_p4), %s1245_s15, 3  ;;  %s988_s26 = sshll.u32 (%p1343_p4), %s330_s23, 5 }
  0x1e   : > { %s334_s2 = scalar_lea.vmem (%p1343_p4), %s1475_s6, %s989_s24  ;;  %s332_s25 = scalar_lea.vmem (%p1343_p4), [#allocation10], %s988_s26 }
  0x1f   : > { %v369_v0 = vld [vmem:[%s334_s2] sm:$0xff] (%p1343_p4)  ;;  %v371_v1 = vld [vmem:[%s334_s2 + $0x10] sm:$0xff] (%p1343_p4) }
  0x20   : > { %v373_v2 = vld [vmem:[%s334_s2 + $0x20] sm:$0xff] (%p1343_p4)  ;;  %370 = vst [vmem:[%s332_s25] sm:$0xff] (%p1343_p4), %v369_v0  ;;  %v375_v3 = vld [vmem:[%s334_s2 + $0x30] sm:$0xff] (%p1343_p4) }
  0x21   : > { %372 = vst [vmem:[%s332_s25 + $0x8] sm:$0xff] %v371_v1 }
  0x22   : > { %374 = vst [vmem:[%s332_s25 + $0x10] sm:$0xff] %v373_v2 }
  0x23   : > { %376 = vst [vmem:[%s332_s25 + $0x18] sm:$0xff] %v375_v3 }
  0x24 PF: > { %397 = sbr.rel (%p1350_p8) target bundleno = 959 (0x3bf), region = 90 }
  0x29   : > { %1220 = dma.done.wait (%p1029_p7), [#allocation6], 6144  }
  0x2a   : > { %1222 = vsyncadd (%p1029_p7), [#allocation6], 4294961152 }
  0x2b   : > { %1224 = dma.done.wait (%p1029_p7), [#allocation9], 6144  }
  0x2c   : > { %1226 = vsyncadd (%p1029_p7), [#allocation9], 4294961152  ;;  %s410_s2 = sand.u32 1, %s1237_s13   ;;  %p448_p12 = scmp.lt.s32.totalorder %s1328_s16, 1 }
  0x2d   : > { %s993_s15 = sshll.u32 %s410_s2, 5  ;;  %457 = sbr.rel (%p985_p6) target bundleno = 281 (0x119), region = 106 }
  0x2e   : > { %s1385_s21 = scalar_select %p448_p12, %s1328_s16, 1 }
  0x2f   : > { %s1395_s19 = scalar_lea.vmem [#allocation10], %s993_s15 }
  0x30   : > { %s450_s30 = scalar_lea.vmem %s1476_s7, %s1385_s21  ;;  %s453_s18 = scalar_lea.vmem %s1477_s8, %s1385_s21 }
  0x32   : > { %v506_v4 = vld [vmem:[#allocation5 + $0x168] sm:$0xff]  ;;  %v503_v5 = vld [vmem:[#allocation5 + $0x150] sm:$0xff]  ;;  %v500_v8 = vld [vmem:[#allocation5 + $0x138] sm:$0xff]  ;;  %vm743_vm2 = vcmask 7168  }
  0x33   : > { %v622_v6 = vld [vmem:[#allocation8 + $0x168] sm:$0xff]  ;;  %517 = vmatpush.msra.mxu0 %v506_v4  ;;  %v619_v7 = vld [vmem:[#allocation8 + $0x150] sm:$0xff]  ;;  %v616_v9 = vld [vmem:[#allocation8 + $0x138] sm:$0xff] }
  0x34   : > { %633 = vmatpush.msra.mxu3 %v622_v6  ;;  %v507_v10 = vld [vmem:[#allocation5 + $0x170] sm:$0xff]  ;;  %v504_v11 = vld [vmem:[#allocation5 + $0x158] sm:$0xff]  ;;  %v497_v12 = vld [vmem:[#allocation5 + $0x120] sm:$0xff] }
  0x35   : > { %518 = vmatpush.msra.mxu0 %v503_v5  ;;  %537 = vmatpush.msra.mxu1 %v507_v10  ;;  %v613_v13 = vld [vmem:[#allocation8 + $0x120] sm:$0xff]  ;;  %v494_v15 = vld [vmem:[#allocation5 + $0x108] sm:$0xff]  ;;  %v491_v18 = vld [vmem:[#allocation5 + $0xf0] sm:$0xff] }
  0x36   : > { %634 = vmatpush.msra.mxu3 %v619_v7  ;;  %v501_v14 = vld [vmem:[#allocation5 + $0x140] sm:$0xff]  ;;  %v610_v16 = vld [vmem:[#allocation8 + $0x108] sm:$0xff]  ;;  %v607_v19 = vld [vmem:[#allocation8 + $0xf0] sm:$0xff] }
  0x37   : > { %519 = vmatpush.msra.mxu0 %v500_v8  ;;  %538 = vmatpush.msra.mxu1 %v504_v11  ;;  %v498_v17 = vld [vmem:[#allocation5 + $0x128] sm:$0xff]  ;;  %v495_v20 = vld [vmem:[#allocation5 + $0x110] sm:$0xff]  ;;  %v488_v21 = vld [vmem:[#allocation5 + $0xd8] sm:$0xff] }
  0x38   : > { %635 = vmatpush.msra.mxu3 %v616_v9  ;;  %v604_v22 = vld [vmem:[#allocation8 + $0xd8] sm:$0xff]  ;;  %v485_v24 = vld [vmem:[#allocation5 + $0xc0] sm:$0xff]  ;;  %v482_v27 = vld [vmem:[#allocation5 + $0xa8] sm:$0xff] }
  0x39   : > { %520 = vmatpush.msra.mxu0 %v497_v12  ;;  %539 = vmatpush.msra.mxu1 %v501_v14  ;;  %v492_v23 = vld [vmem:[#allocation5 + $0xf8] sm:$0xff]  ;;  %v601_v25 = vld [vmem:[#allocation8 + $0xc0] sm:$0xff]  ;;  %v598_v28 = vld [vmem:[#allocation8 + $0xa8] sm:$0xff] }
  0x3a   : > { %636 = vmatpush.msra.mxu3 %v613_v13  ;;  %v489_v26 = vld [vmem:[#allocation5 + $0xe0] sm:$0xff]  ;;  %v486_v29 = vld [vmem:[#allocation5 + $0xc8] sm:$0xff]  ;;  %v479_v30 = vld [vmem:[#allocation5 + $0x90] sm:$0xff] }
  0x3b   : > { %521 = vmatpush.msra.mxu0 %v494_v15  ;;  %540 = vmatpush.msra.mxu1 %v498_v17  ;;  %v595_v31 = vld [vmem:[#allocation8 + $0x90] sm:$0xff]  ;;  %v508_v32 = vld [vmem:[#allocation5 + $0x178] sm:$0xff]  ;;  %v505_v34 = vld [vmem:[#allocation5 + $0x160] sm:$0xff] }
  0x3c   : > { %637 = vmatpush.msra.mxu3 %v610_v16  ;;  %v483_v33 = vld [vmem:[#allocation5 + $0xb0] sm:$0xff]  ;;  %v476_v35 = vld [vmem:[#allocation5 + $0x78] sm:$0xff]  ;;  %557 = vmatpush.msra.mxu2 %v508_v32  ;;  %v502_v38 = vld [vmem:[#allocation5 + $0x148] sm:$0xff] }
  0x3d   : > { %522 = vmatpush.msra.mxu0 %v491_v18  ;;  %541 = vmatpush.msra.mxu1 %v495_v20  ;;  %v592_v36 = vld [vmem:[#allocation8 + $0x78] sm:$0xff]  ;;  %v473_v39 = vld [vmem:[#allocation5 + $0x60] sm:$0xff]  ;;  %v499_v42 = vld [vmem:[#allocation5 + $0x130] sm:$0xff] }
  0x3e   : > { %638 = vmatpush.msra.mxu3 %v607_v19  ;;  %v480_v37 = vld [vmem:[#allocation5 + $0x98] sm:$0xff]  ;;  %v589_v40 = vld [vmem:[#allocation8 + $0x60] sm:$0xff]  ;;  %558 = vmatpush.msra.mxu2 %v505_v34  ;;  %v470_v43 = vld [vmem:[#allocation5 + $0x48] sm:$0xff] }
  0x3f   : > { %523 = vmatpush.msra.mxu0 %v488_v21  ;;  %542 = vmatpush.msra.mxu1 %v492_v23  ;;  %v477_v41 = vld [vmem:[#allocation5 + $0x80] sm:$0xff]  ;;  %v586_v44 = vld [vmem:[#allocation8 + $0x48] sm:$0xff]  ;;  %v496_v46 = vld [vmem:[#allocation5 + $0x118] sm:$0xff] }
  0x40   : > { %639 = vmatpush.msra.mxu3 %v604_v22  ;;  %559 = vmatpush.msra.mxu2 %v502_v38  ;;  %v474_v45 = vld [vmem:[#allocation5 + $0x68] sm:$0xff]  ;;  %v467_v47 = vld [vmem:[#allocation5 + $0x30] sm:$0xff]  ;;  %v493_v50 = vld [vmem:[#allocation5 + $0x100] sm:$0xff] }
  0x41   : > { %524 = vmatpush.msra.mxu0 %v485_v24  ;;  %543 = vmatpush.msra.mxu1 %v489_v26  ;;  %v583_v48 = vld [vmem:[#allocation8 + $0x30] sm:$0xff]  ;;  %v464_v51 = vld [vmem:[#allocation5 + $0x18] sm:$0xff]  ;;  %v490_v55 = vld [vmem:[#allocation5 + $0xe8] sm:$0xff] }
  0x42   : > { %640 = vmatpush.msra.mxu3 %v601_v25  ;;  %560 = vmatpush.msra.mxu2 %v499_v42  ;;  %v471_v49 = vld [vmem:[#allocation5 + $0x50] sm:$0xff]  ;;  %v580_v52 = vld [vmem:[#allocation8 + $0x18] sm:$0xff]  ;;  %v461_v56 = vld [vmem:[#allocation5] sm:$0xff] }
  0x43   : > { %525 = vmatpush.msra.mxu0 %v482_v27  ;;  %544 = vmatpush.msra.mxu1 %v486_v29  ;;  %v458_v53 = vld [vmem:[%s1469_s0] sm:$0xff]  ;;  %v468_v54 = vld [vmem:[#allocation5 + $0x38] sm:$0xff]  ;;  %v577_v57 = vld [vmem:[#allocation8] sm:$0xff] }
  0x44   : > { %641 = vmatpush.msra.mxu3 %v598_v28  ;;  %561 = vmatpush.msra.mxu2 %v496_v46  ;;  %v623_v58 = vld [vmem:[#allocation8 + $0x170] sm:$0xff]  ;;  %v1407_v60 = vmax.f32 %v458_v53, 0.0  ;;  %v465_v61 = vld [vmem:[#allocation5 + $0x20] sm:$0xff]  ;;  %v620_v62 = vld [vmem:[#allocation8 + $0x158] sm:$0xff] }
  0x45   : > { %526 = vmatpush.msra.mxu0 %v479_v30  ;;  %545 = vmatpush.msra.mxu1 %v483_v33  ;;  %v1405_v59 = vld [vmem:[%s1470_s1] sm:$0xff]  ;;  %v617_v1 = vld [vmem:[#allocation8 + $0x140] sm:$0xff]  ;;  %v624_v2 = vld [vmem:[#allocation8 + $0x178] sm:$0xff] }
  0x46   : > { %642 = vmatpush.msra.mxu3 %v595_v31  ;;  %562 = vmatpush.msra.mxu2 %v493_v50  ;;  %v487_v63 = vld [vmem:[#allocation5 + $0xd0] sm:$0xff]  ;;  %v462_v0 = vld [vmem:[#allocation5 + $0x8] sm:$0xff]  ;;  %v484_v3 = vld [vmem:[#allocation5 + $0xb8] sm:$0xff] }
  0x47   : > { %527 = vmatpush.msra.mxu0 %v476_v35  ;;  %546 = vmatpush.msra.mxu1 %v480_v37  ;;  %v614_v4 = vld [vmem:[#allocation8 + $0x128] sm:$0xff]  ;;  %v621_v5 = vld [vmem:[#allocation8 + $0x160] sm:$0xff]  ;;  %v611_v7 = vld [vmem:[#allocation8 + $0x110] sm:$0xff] }
  0x48   : > { %643 = vmatpush.msra.mxu3 %v592_v36  ;;  %563 = vmatpush.msra.mxu2 %v490_v55  ;;  %v481_v6 = vld [vmem:[#allocation5 + $0xa0] sm:$0xff]  ;;  %v618_v8 = vld [vmem:[#allocation8 + $0x148] sm:$0xff]  ;;  %v608_v10 = vld [vmem:[#allocation8 + $0xf8] sm:$0xff] }
  0x49   : > { %528 = vmatpush.msra.mxu0 %v473_v39  ;;  %547 = vmatpush.msra.mxu1 %v477_v41  ;;  %v478_v9 = vld [vmem:[#allocation5 + $0x88] sm:$0xff]  ;;  %v615_v11 = vld [vmem:[#allocation8 + $0x130] sm:$0xff]  ;;  %v605_v13 = vld [vmem:[#allocation8 + $0xe0] sm:$0xff] }
  0x4a   : > { %644 = vmatpush.msra.mxu3 %v589_v40  ;;  %564 = vmatpush.msra.mxu2 %v487_v63  ;;  %v475_v12 = vld [vmem:[#allocation5 + $0x70] sm:$0xff]  ;;  %v612_v14 = vld [vmem:[#allocation8 + $0x118] sm:$0xff]  ;;  %v602_v16 = vld [vmem:[#allocation8 + $0xc8] sm:$0xff] }
  0x4b   : > { %529 = vmatpush.msra.mxu0 %v470_v43  ;;  %548 = vmatpush.msra.mxu1 %v474_v45  ;;  %v472_v15 = vld [vmem:[#allocation5 + $0x58] sm:$0xff]  ;;  %v609_v17 = vld [vmem:[#allocation8 + $0x100] sm:$0xff]  ;;  %v599_v19 = vld [vmem:[#allocation8 + $0xb0] sm:$0xff] }
  0x4c   : > { %645 = vmatpush.msra.mxu3 %v586_v44  ;;  %565 = vmatpush.msra.mxu2 %v484_v3  ;;  %v469_v18 = vld [vmem:[#allocation5 + $0x40] sm:$0xff]  ;;  %v606_v20 = vld [vmem:[#allocation8 + $0xe8] sm:$0xff]  ;;  %v596_v22 = vld [vmem:[#allocation8 + $0x98] sm:$0xff] }
  0x4d   : > { %530 = vmatpush.msra.mxu0 %v467_v47  ;;  %549 = vmatpush.msra.mxu1 %v471_v49  ;;  %v466_v21 = vld [vmem:[#allocation5 + $0x28] sm:$0xff]  ;;  %v603_v23 = vld [vmem:[#allocation8 + $0xd0] sm:$0xff]  ;;  %v593_v25 = vld [vmem:[#allocation8 + $0x80] sm:$0xff] }
  0x4e   : > { %646 = vmatpush.msra.mxu3 %v583_v48  ;;  %566 = vmatpush.msra.mxu2 %v481_v6  ;;  %v463_v24 = vld [vmem:[#allocation5 + $0x10] sm:$0xff]  ;;  %v600_v26 = vld [vmem:[#allocation8 + $0xb8] sm:$0xff]  ;;  %v590_v27 = vld [vmem:[#allocation8 + $0x68] sm:$0xff] }
  0x4f   : > { %531 = vmatpush.msra.mxu0 %v464_v51  ;;  %550 = vmatpush.msra.mxu1 %v468_v54  ;;  %v597_v28 = vld [vmem:[#allocation8 + $0xa0] sm:$0xff]  ;;  %v587_v29 = vld [vmem:[#allocation8 + $0x50] sm:$0xff]  ;;  %v594_v30 = vld [vmem:[#allocation8 + $0x88] sm:$0xff] }
  0x50   : > { %647 = vmatpush.msra.mxu3 %v580_v52  ;;  %567 = vmatpush.msra.mxu2 %v478_v9  ;;  %v584_v31 = vld [vmem:[#allocation8 + $0x38] sm:$0xff]  ;;  %v591_v32 = vld [vmem:[#allocation8 + $0x70] sm:$0xff]  ;;  %v581_v33 = vld [vmem:[#allocation8 + $0x20] sm:$0xff] }
  0x51   : > { %532 = vmatpush.msra.mxu0 %v461_v56  ;;  %551 = vmatpush.msra.mxu1 %v465_v61  ;;  %v588_v34 = vld [vmem:[#allocation8 + $0x58] sm:$0xff]  ;;  %v578_v35 = vld [vmem:[#allocation8 + $0x8] sm:$0xff]  ;;  %v585_v36 = vld [vmem:[#allocation8 + $0x40] sm:$0xff] }
  0x52   : > { %648 = vmatpush.msra.mxu3 %v577_v57  ;;  %533 = vmatmul.f32.vlgmr.msra.gmra.mxu0 %v1407_v60  ;;  %v582_v37 = vld [vmem:[#allocation8 + $0x28] sm:$0xff]  ;;  %v579_v38 = vld [vmem:[#allocation8 + $0x10] sm:$0xff] }
  0x53   : > { %653 = vmatpush.msrb.mxu0 %v623_v58  ;;  %649 = vmatmul.f32.vlgmr.msra.gmra.mxu3 %v1405_v59  ;;  %v509_v39 = vld [vmem:[%s1473_s4] sm:$0x7] }
  0x54   : > { %552 = vmatpush.msra.mxu1 %v462_v0  ;;  %568 = vmatpush.msra.mxu2 %v475_v12  ;;  %v625_v40 = vld [vmem:[%s1474_s5] sm:$0x7]  ;;  %v511_v41 = vperm.slane %v509_v39, 0  ;;  %v512_v51 = vperm.slane %v509_v39, 1  ;;  %v513_v12 = vperm.slane %v509_v39, 2 }
  0x55   : > { %654 = vmatpush.msrb.mxu0 %v620_v62  ;;  %553 = vmatmul.f32.vlgmr.msra.gmra.mxu1 %v1407_v60  ;;  %v627_v43 = vperm.slane %v625_v40, 0  ;;  %v628_v54 = vperm.slane %v625_v40, 1 }
  0x56   : > { %673 = vmatpush.msrb.mxu1 %v624_v2  ;;  %569 = vmatpush.msra.mxu2 %v472_v15 }
  0x57   : > { %655 = vmatpush.msrb.mxu0 %v617_v1  ;;  %v1251_v1 = vmov -inf  }
  0x58   : > { %674 = vmatpush.msrb.mxu1 %v621_v5  ;;  %570 = vmatpush.msra.mxu2 %v469_v18  ;;  %744 = vst.msk [vmem:[#allocation3] sm:$0xff] %vm743_vm2, %v1251_v1  ;;  %v629_v5 = vperm.slane %v625_v40, 2 }
  0x59   : > { %656 = vmatpush.msrb.mxu0 %v614_v4  ;;  %v1252_v4 = vmov 0.0  }
  0x5a   : > { %675 = vmatpush.msrb.mxu1 %v618_v8  ;;  %571 = vmatpush.msra.mxu2 %v466_v21  ;;  %745 = vst.msk [vmem:[#allocation4] sm:$0xff] %vm743_vm2, %v1252_v4 }
  0x5b   : > { %657 = vmatpush.msrb.mxu0 %v611_v7 }
  0x5c   : > { %676 = vmatpush.msrb.mxu1 %v615_v11  ;;  %572 = vmatpush.msra.mxu2 %v463_v24 }
  0x5d   : > { %658 = vmatpush.msrb.mxu0 %v608_v10  ;;  %573 = vmatmul.f32.vlgmr.msra.gmra.mxu2 %v1407_v60 }
  0x5e   : > { %677 = vmatpush.msrb.mxu1 %v612_v14 }
  0x5f   : > { %659 = vmatpush.msrb.mxu0 %v605_v13 }
  0x60   : > { %678 = vmatpush.msrb.mxu1 %v609_v17 }
  0x61   : > { %660 = vmatpush.msrb.mxu0 %v602_v16 }
  0x62   : > { %679 = vmatpush.msrb.mxu1 %v606_v20 }
  0x63   : > { %661 = vmatpush.msrb.mxu0 %v599_v19 }
  0x64   : > { %680 = vmatpush.msrb.mxu1 %v603_v23 }
  0x65   : > { %662 = vmatpush.msrb.mxu0 %v596_v22 }
  0x66   : > { %681 = vmatpush.msrb.mxu1 %v600_v26 }
  0x67   : > { %663 = vmatpush.msrb.mxu0 %v593_v25 }
  0x68   : > { %682 = vmatpush.msrb.mxu1 %v597_v28 }
  0x69   : > { %664 = vmatpush.msrb.mxu0 %v590_v27 }
  0x6a   : > { %683 = vmatpush.msrb.mxu1 %v594_v30 }
  0x6b   : > { %665 = vmatpush.msrb.mxu0 %v587_v29 }
  0x6c   : > { %684 = vmatpush.msrb.mxu1 %v591_v32 }
  0x6d   : > { %666 = vmatpush.msrb.mxu0 %v584_v31 }
  0x6e   : > { %685 = vmatpush.msrb.mxu1 %v588_v34 }
  0x6f   : > { %667 = vmatpush.msrb.mxu0 %v581_v33 }
  0x70   : > { %686 = vmatpush.msrb.mxu1 %v585_v36 }
  0x71   : > { %668 = vmatpush.msrb.mxu0 %v578_v35 }
  0x72   : > { %669 = vmatmul.f32.vlgmr.msrb.gmra.mxu0 %v1405_v59  ;;  %687 = vmatpush.msrb.mxu1 %v582_v37 }
  0x74   : > { %688 = vmatpush.msrb.mxu1 %v579_v38 }
  0x75   : > { %689 = vmatmul.f32.vlgmr.msrb.gmra.mxu1 %v1405_v59 }
  0xcf   : > { %v534_v42 = vpop.f32.mrf.mxu0 }
  0xd0   : > { %v535_v44 = vadd.f32 %v534_v42, %v511_v41 }
  0xd2   : > { %v554_v52 = vpop.f32.mrf.mxu1 }
  0xd3   : > { %v555_v56 = vadd.f32 %v554_v52, %v512_v51 }
  0xd6   : > { %v650_v45 = vpop.f32.mrf.mxu3 }
  0xd7   : > { %v651_v46 = vadd.f32 %v650_v45, %v627_v43 }
  0xd9   : > { %v693_v47 = vadd.f32 %v651_v46, %v535_v44 }
  0xdb   : > { %v995_v48 = vmul.f32 -1.442695, %v693_v47 }
  0xdd   : > { %1071 = vpow2.f32 %v995_v48 }
  0xe0   : > { %v574_v14 = vpop.f32.mrf.mxu2 }
  0xe1   : > { %v575_v16 = vadd.f32 %v574_v14, %v513_v12 }
  0xe3   : > { %v1072_v49 = vpop.eup %1071 }
  0xe4   : > { %v697_v50 = vadd.f32 1.0, %v1072_v49 }
  0xe6   : > { %1073 = vrcp.f32 %v697_v50  ;;  %vm703_vm0 = vweird.f32 %v697_v50  ;;  %v709_v0 = vand.u32 2147483648, %v697_v50  ;;  %v707_v3 = vand.u32 2147483647, %v697_v50 }
  0xe8   : > { %v710_v8 = vor.u32 1.1754944e-38, %v709_v0  ;;  %vm708_vm4 = vcmp.eq.f32.partialorder %v707_v3, 8.507059e+37 }
  0xec   : > { %v1074_v53 = vpop.eup %1073 }
  0xed   : > { %v699_v55 = vmul.f32 %v1074_v53, %v697_v50  ;;  %vm704_vm1 = vweird.f32 %v1074_v53 }
  0xee   : > { %vm705_vm3 = vmor %vm703_vm0, %vm704_vm1 }
  0xef   : > { %v670_v57 = vpop.f32.mrf.mxu0  ;;  %v700_v60 = vsub.f32 1.0, %v699_v55 }
  0xf0   : > { %v671_v58 = vadd.f32 %v670_v57, %v628_v54 }
  0xf1   : > { %v701_v63 = vmul.f32 %v1074_v53, %v700_v60 }
  0xf2   : > { %v713_v61 = vadd.f32 %v671_v58, %v555_v56  ;;  %v690_v7 = vpop.f32.mrf.mxu1 }
  0xf3   : > { %v702_v2 = vadd.f32 %v1074_v53, %v701_v63  ;;  %v691_v11 = vadd.f32 %v690_v7, %v629_v5 }
  0xf4   : > { %v996_v62 = vmul.f32 -1.442695, %v713_v61 }
  0xf5   : > { %v706_v10 = vsel %vm705_vm3, %v1074_v53, %v702_v2 }
  0xf6   : > { %1075 = vpow2.f32 %v996_v62  ;;  %v711_v13 = vsel %vm708_vm4, %v710_v8, %v706_v10 }
  0xf7   : > { %v733_v15 = vmul.f32 %v711_v13, %v691_v11 }
  0xf9   : > { %v734_v19 = vadd.f32 %v733_v15, %v575_v16 }
  0xfc   : > { %v1076_v6 = vpop.eup %1075 }
  0xfd   : > { %v717_v9 = vadd.f32 1.0, %v1076_v6 }
  0xff   : > { %1077 = vrcp.f32 %v717_v9  ;;  %v729_v21 = vand.u32 2147483648, %v717_v9  ;;  %v727_v23 = vand.u32 2147483647, %v717_v9  ;;  %vm723_vm6 = vweird.f32 %v717_v9 }
 0x100   : > { %1079 = vtanh.f32 %v734_v19 }
 0x101   : > { %v730_v25 = vor.u32 1.1754944e-38, %v729_v21  ;;  %vm728_vm8 = vcmp.eq.f32.partialorder %v727_v23, 8.507059e+37 }
 0x105   : > { %v1078_v17 = vpop.eup %1077 }
 0x106   : > { %v719_v18 = vmul.f32 %v1078_v17, %v717_v9  ;;  %vm724_vm5 = vweird.f32 %v1078_v17  ;;  %v1080_v29 = vpop.eup %1079 }
 0x107   : > { %vm725_vm7 = vmor %vm723_vm6, %vm724_vm5 }
 0x108   : > { %v720_v20 = vsub.f32 1.0, %v719_v18 }
 0x10a   : > { %v721_v22 = vmul.f32 %v1078_v17, %v720_v20 }
 0x10c   : > { %v722_v24 = vadd.f32 %v1078_v17, %v721_v22 }
 0x10e   : > { %v726_v26 = vsel %vm725_vm7, %v1078_v17, %v722_v24 }
 0x10f   : > { %v731_v27 = vsel %vm728_vm8, %v730_v25, %v726_v26 }
 0x110   : > { %v736_v28 = vsub.f32 1.0, %v731_v27  ;;  %v738_v31 = vmul.f32 %v731_v27, %v1405_v59 }
 0x112   : > { %v737_v30 = vmul.f32 %v1080_v29, %v736_v28 }
 0x114   : > { %v739_v32 = vadd.f32 %v738_v31, %v737_v30 }
 0x116   : > { %740 = vst [vmem:[#allocation12] sm:$0xff] %v739_v32  ;;  %v741_v33 = vpack.c.bf16 %v739_v32, %v739_v32 }
 0x118   : > { %742 = vst [vmem:[#allocation2] sm:$0xf] %v741_v33 }
 0x119 PF: > { %v749_v34 = vld [vmem:[%s1395_s19 + $0x18] sm:$0xff]  ;;  %v748_v35 = vld [vmem:[%s1395_s19 + $0x10] sm:$0xff]  ;;  %v747_v51 = vld [vmem:[%s1395_s19 + $0x8] sm:$0xff]  ;;  %s997_s15 = sshll.u32 %s1328_s16, 7  ;;  %v1253_v21 = vmov 0   ;;  %vm840_vm9 = vcmask 7168  }
 0x11a   : > { %v764_v36 = vunpack.c.2.s8 %v749_v34  ;;  %v765_v37 = vunpack.c.3.s8 %v749_v34  ;;  %v762_v38 = vunpack.c.0.s8 %v749_v34  ;;  %v763_v39 = vunpack.c.1.s8 %v749_v34  ;;  %v746_v63 = vld [vmem:[%s1395_s19] sm:$0xff]  ;;  %s815_s22 = sshra.s32 %s997_s15, 7  ;;  %v1082_v15 = vld [vmem:[%s450_s30] ss:$0 sm:$0xff]  ;;  %1081 = vset.pattern.permute.xlu0 %v1253_v21  ;;  %v820_v22 = vld [vmem:[#allocation3] sm:$0xff]  ;;  %p999_p13 = scmp.ne.s32.totalorder %s1328_s16, 1 }
 0x11b   : > { %v760_v40 = vunpack.c.2.s8 %v748_v35  ;;  %v761_v41 = vunpack.c.3.s8 %v748_v35  ;;  %v758_v46 = vunpack.c.0.s8 %v748_v35  ;;  %v759_v47 = vunpack.c.1.s8 %v748_v35  ;;  %v1083_v16 = vld [vmem:[%s453_s18] ss:$0 sm:$0xff]  ;;  %s998_s13 = sshll.u32 %s815_s22, 3  ;;  %v827_v32 = vld [vmem:[#allocation4] sm:$0xff] }
 0x11c   : > { %v780_v42 = vcvt.s32.f32 %v764_v36  ;;  %v781_v43 = vcvt.s32.f32 %v765_v37  ;;  %v778_v44 = vcvt.s32.f32 %v762_v38  ;;  %v779_v59 = vcvt.s32.f32 %v763_v39  ;;  %s818_s23 = scalar_lea.vmem [#allocation11], %s998_s13 }
 0x11d   : > { %v776_v49 = vcvt.s32.f32 %v760_v40  ;;  %v777_v50 = vcvt.s32.f32 %v761_v41  ;;  %v774_v52 = vcvt.s32.f32 %v758_v46  ;;  %v775_v53 = vcvt.s32.f32 %v759_v47 }
 0x11e   : > { %v789_v45 = vpack.c.bf16 %v781_v43, %v780_v42  ;;  %v788_v48 = vpack.c.bf16 %v779_v59, %v778_v44  ;;  %v756_v55 = vunpack.c.2.s8 %v747_v51  ;;  %v757_v56 = vunpack.c.3.s8 %v747_v51 }
 0x11f   : > { %v787_v54 = vpack.c.bf16 %v777_v50, %v776_v49  ;;  %v786_v57 = vpack.c.bf16 %v775_v53, %v774_v52  ;;  %v754_v61 = vunpack.c.0.s8 %v747_v51  ;;  %v755_v62 = vunpack.c.1.s8 %v747_v51  ;;  %v790_v14 = vld [vmem:[#allocation2] sm:$0xf] }
 0x120   : > { %791 = vmatpush.bf16.msra.mxu0 %v789_v45  ;;  %v772_v58 = vcvt.s32.f32 %v756_v55  ;;  %v773_v60 = vcvt.s32.f32 %v757_v56  ;;  %v752_v0 = vunpack.c.2.s8 %v746_v63  ;;  %v753_v4 = vunpack.c.3.s8 %v746_v63 }
 0x121   : > { %v770_v2 = vcvt.s32.f32 %v754_v61  ;;  %v771_v3 = vcvt.s32.f32 %v755_v62  ;;  %v750_v5 = vunpack.c.0.s8 %v746_v63  ;;  %v751_v9 = vunpack.c.1.s8 %v746_v63 }
 0x122   : > { %v785_v1 = vpack.c.bf16 %v773_v60, %v772_v58  ;;  %v768_v7 = vcvt.s32.f32 %v752_v0  ;;  %v769_v8 = vcvt.s32.f32 %v753_v4 }
 0x123   : > { %v784_v6 = vpack.c.bf16 %v771_v3, %v770_v2  ;;  %v766_v11 = vcvt.s32.f32 %v750_v5  ;;  %v767_v12 = vcvt.s32.f32 %v751_v9 }
 0x124   : > { %792 = vmatpush.bf16.msra.mxu0 %v788_v48  ;;  %v783_v10 = vpack.c.bf16 %v769_v8, %v768_v7 }
 0x125   : > { %v782_v13 = vpack.c.bf16 %v767_v12, %v766_v11 }
 0x128   : > { %793 = vmatpush.bf16.msra.mxu0 %v787_v54 }
 0x12c   : > { %794 = vmatpush.bf16.msra.mxu0 %v786_v57 }
 0x130   : > { %795 = vmatpush.bf16.msra.mxu0 %v785_v1 }
 0x134   : > { %796 = vmatpush.bf16.msra.mxu0 %v784_v6 }
 0x138   : > { %797 = vmatpush.bf16.msra.mxu0 %v783_v10 }
 0x13c   : > { %798 = vmatpush.bf16.msra.mxu0 %v782_v13 }
 0x13f   : > { %799 = vmatmul.bf16.vlgmr.msra.gmra.mxu0 %v790_v14 }
 0x1bc   : > { %v800_v17 = vpop.f32.mrf.mxu0 }
 0x1bd   : > { %v808_v18 = vmul.f32 %v1082_v15, %v800_v17 }
 0x1bf   : > { %v813_v19 = vadd.f32 %v1083_v16, %v808_v18 }
 0x1c1   : > { %819 = vst [vmem:[%s818_s23] sm:$0xff] %v813_v19  ;;  %821 = vmax.xlane.f32.xlu0 %v813_v19 }
 0x1c4   : > { %v802_v20 = vpop.f32.mrf.mxu0 }
 0x234   : > { %v822_v23 = vpop.xlane.xlu0 %821 }
 0x235   : > { %v823_v24 = vmax.f32 %v820_v22, %v822_v23 }
 0x237   : > { %v824_v25 = vsub.f32 %v820_v22, %v823_v24  ;;  %842 = vst.msk [vmem:[#allocation3] sm:$0xff] %vm840_vm9, %v823_v24  ;;  %831 = vperm.xlu0 %1081, %v823_v24  }
 0x239   : > { %v825_v30 = vmul.f32 1.442695, %v824_v25 }
 0x2a9   : > { %v832_v26 = vpop.permute.xlu0 %831 }
 0x2aa   : > { %v834_v27 = vsub.f32 %v813_v19, %v832_v26 }
 0x2ac   : > { %v835_v28 = vmul.f32 1.442695, %v834_v27 }
 0x2ae   : > { %1084 = vpow2.f32 %v835_v28 }
 0x2af   : > { %1086 = vpow2.f32 %v825_v30 }
 0x2b4   : > { %v1085_v29 = vpop.eup %1084 }
 0x2b5   : > { %837 = vadd.xlane.f32.xlu1 %v1085_v29  ;;  %v1087_v31 = vpop.eup %1086 }
 0x2b6   : > { %v828_v33 = vmul.f32 %v1087_v31, %v827_v32 }
 0x327   : > { %846 = sbr.rel (%p999_p13) target bundleno = 949 (0x3b5), region = 110 }
 0x328   : > { %v838_v34 = vpop.xlane.xlu1 %837 }
 0x329   : > { %v839_v35 = vadd.f32 %v838_v34, %v828_v33 }
 0x32b   : > { %841 = vst.msk [vmem:[#allocation4] sm:$0xff] %vm840_vm9, %v839_v35 }
 0x32c   : > { %v1254_v37 = vmov 0   ;;  %v847_v39 = vld [vmem:[#allocation3] sm:$0xff]  ;;  %v852_v42 = vld [vmem:[#allocation11] sm:$0xff]  ;;  %v853_v43 = vld [vmem:[#allocation11 + $0x8] sm:$0xff] }
 0x32d   : > { %1088 = vset.pattern.permute.xlu0 %v1254_v37 }
 0x332   : > { %v848_v36 = vld [vmem:[#allocation4] sm:$0xff] }
 0x333   : > { %1089 = vlog2.f32 %v848_v36 }
 0x339   : > { %v1090_v38 = vpop.eup %1089 }
 0x33a   : > { %v850_v40 = vmul.f32 0.6931472, %v1090_v38 }
 0x33c   : > { %v851_v41 = vadd.f32 %v850_v40, %v847_v39 }
 0x33e   : > { %856 = vperm.xlu0 %1088, %v851_v41  }
 0x3b0   : > { %v857_v44 = vpop.permute.xlu0 %856 }
 0x3b1   : > { %v859_v59 = vsub.f32 %v852_v42, %v857_v44  ;;  %v860_v45 = vsub.f32 %v853_v43, %v857_v44 }
 0x3b3   : > { %861 = vst [vmem:[#allocation11] sm:$0xff] %v859_v59 }
 0x3b4   : > { %862 = vst [vmem:[#allocation11 + $0x8] sm:$0xff] %v860_v45 }
 0x3b5 PF: > { %p1033_p0 = scmp.eq.s32.totalorder %s1328_s16, 1  ;;  %s1255_s21 = smov [#allocation11]  }
 0x3b6   : > { %s869_s30 = sshll.u32 %s1255_s21, 4  ;;  %s871_s26 = sshll.u32 %s1478_s9, 4  ;;  %s870_s30 = int_to_ptr.vmem [resolvable:$true] %s869_s30  ;;  %s872_s26 = int_to_ptr.hbm [resolvable:$true] %s871_s26 }
 0x3b7   : > { %1015 = dma.vmem_to_hbm [thread:$0]  (%p1033_p0), %s870_s30, 256, %s872_s26, [#allocation7]  }
 0x3b8   : > { %s883_s25 = sshll.u32 %s1479_s10, 4  ;;  %s1256_s2 = smov [#allocation12]   ;;  %s884_s25 = int_to_ptr.hbm [resolvable:$true] %s883_s25 }
 0x3b9   : > { %s881_s15 = sshll.u32 %s1256_s2, 4  ;;  %s882_s15 = int_to_ptr.vmem [resolvable:$true] %s881_s15 }
 0x3ba   : > { %1017 = dma.vmem_to_hbm [thread:$0]  (%p1033_p0), %s882_s15, 128, %s884_s25, [#allocation13]  }
 0x3bb   : > { %1228 = dma.done.wait (%p1033_p0), [#allocation7], 256  }
 0x3bc   : > { %1230 = vsyncadd (%p1033_p0), [#allocation7], 4294967040 }
 0x3bd   : > { %1232 = dma.done.wait (%p1033_p0), [#allocation13], 128  }
 0x3be   : > { %1234 = vsyncadd (%p1033_p0), [#allocation13], 4294967168 }
 0x3bf PF: > { %p22_p1 = scmp.ge.s32.totalorder %s1331_s17, 4   ;;  %s1484_s13 = smov %s1241_s14 }
 0x3c0   : > { %s1485_s14 = smov %s1341_s20  ;;  %s1486_s15 = smov %s1331_s17 }
 0x3c1   :  { %24 = sbr.rel (!%p22_p1) target bundleno = 7 (0x7), region = 158 }
 0x3c6   :  { %902 = vsyncpa [#allocation6], 1 }
 0x3c7   :  { %904 = vsyncpa [#allocation6 + $0x1], 1 }
 0x3c8   :  { %905 = vsyncpa [#allocation9], 1 }
 0x3c9   :  { %906 = vsyncpa [#allocation7], 1 }
 0x3ca   :  { %908 = vsyncpa [#allocation7 + $0x1], 1 }
 0x3cb   :  { %909 = vsyncpa [#allocation13], 1 }

</bundles_post_ra>
